<compile_context>
chip_gen: v7x
topology: tpu7x:2x2x1
jax: 0.10.0
libtpu: 0.0.40
codegen_flags: <defaults>
</compile_context>

<pallas_src>
import functools

import jax
import jax.numpy as jnp
from jax.experimental import pallas as pl
from jax.experimental.pallas import tpu as pltpu


# -------- Pass 1: support = x @ W^T + b  (the nn.Linear) ---------------------
def linear_kernel(x_ref, wt_ref, b_ref, sup_ref):
    # x_ref: (tm_lin, d_in) bf16, wt_ref: (d_in, d_out) bf16 (pre-transposed),
    # b_ref: (1, d_out) f32, sup_ref: (tm_lin, d_out) bf16.
    sup = jnp.dot(x_ref[...], wt_ref[...], preferred_element_type=jnp.float32)
    sup_ref[...] = (sup + b_ref[...]).astype(sup_ref.dtype)


# -------- Pass 2: out = adj @ support  (tiled over rows x contraction) -------
def _aggregate_step(adj_ref, sup_ref, acc_ref, tk):
    """One (row-tile, k-tile) step, accumulating in f32 into acc_ref."""
    k = pl.program_id(1)

    @pl.when(k == 0)
    def _():
        acc_ref[...] = jnp.zeros_like(acc_ref)

    start = pl.multiple_of(k * tk, tk)
    sup = sup_ref[pl.ds(start, tk), :]               # slice of VMEM-resident support
    adj = adj_ref[...].astype(sup.dtype)             # int8/bf16 -> bf16 on the VPU
    acc_ref[...] += jnp.dot(adj, sup, preferred_element_type=jnp.float32)


def aggregate_f32_kernel(adj_ref, sup_ref, out_ref, *, tk):
    # f32 output: accumulate directly into the resident output block.
    _aggregate_step(adj_ref, sup_ref, out_ref, tk)


def aggregate_cast_kernel(adj_ref, sup_ref, out_ref, acc_ref, *, tk):
    # Narrow output dtype: accumulate in f32 scratch, cast once at the end.
    _aggregate_step(adj_ref, sup_ref, acc_ref, tk)

    @pl.when(pl.program_id(1) == pl.num_programs(1) - 1)
    def _():
        out_ref[...] = acc_ref[...].astype(out_ref.dtype)


def _pick_tile(n, cap, prefer, align):
    """Largest divisor of n <= cap that is a multiple of `prefer` (else `align`)."""
    cap = min(cap, n)
    for a in (prefer, align):
        t = (cap // a) * a
        while t >= a:
            if n % t == 0:
                return t
            t -= a
    # TODO(synk): pad/mask path for dims with no aligned divisor; full-dim fallback.
    return n


def _vmem_limit_bytes():
    """~75% of per-core VMEM: ~48 MiB on v7x, ~96 MiB on v5e/v6e."""
    try:
        cap = pltpu.get_tpu_info().vmem_capacity_bytes
    except Exception:
        cap = 64 * 1024 * 1024
    return int(max(32 * 1024 * 1024, min(cap * 3 // 4, 112 * 1024 * 1024)))


def graph_convolution(x, adj, weight, bias, *, tm=None, tk=None, tm_lin=None,
                      binary_adj=True, compute_dtype=jnp.bfloat16):
    """GCN forward: adj @ (x @ W.T + b).  x:[N,D_in], adj:[N,N], weight:[D_out,D_in]."""
    n, d_in = x.shape
    d_out = weight.shape[0]
    out_dtype = x.dtype

    # TODO(synk): when d_out > d_in, swap matmul order (adj @ x first, then the
    # linear with an adj-rowsum bias term) so the O(N^2) matmul width is min(d_in,d_out).

    xc = x.astype(compute_dtype)
    wt = weight.T.astype(compute_dtype)            # (d_in, d_out), transposed once here
    b2 = bias.astype(jnp.float32).reshape(1, d_out)
    adjc = adj.astype(jnp.int8 if binary_adj else compute_dtype)

    vmem_limit = _vmem_limit_bytes()
    budget = int(vmem_limit * 0.7)                 # headroom for Mosaic internal scratch

    # Row tiles: prefer multiples of 256 (fills the 256-row MXU on v6e/v7x and
    # keeps int8/bf16 sublane packing aligned), capped at 1024.
    if tm is None:
        tm = _pick_tile(n, 1024, prefer=256, align=32)
    if tm_lin is None:
        tm_lin = _pick_tile(n, 1024, prefer=256, align=32)

    # Contraction tile: sized so (double-buffered int8 adj tile + resident bf16
    # support + resident f32 out tile) fits the per-generation VMEM budget.
    sup_bytes = 2 * n * d_out * jnp.dtype(compute_dtype).itemsize
    out_bytes = 2 * tm * d_out * 4
    if tk is None:
        tk_cap_bytes = max(budget - sup_bytes - out_bytes, 1 << 20)
        tk_cap = max(128, tk_cap_bytes // (2 * tm * adjc.dtype.itemsize))
        tk = _pick_tile(n, min(4096, tk_cap), prefer=512, align=128)

    assert n % tm == 0 and n % tk == 0 and n % tm_lin == 0, (
        f"N={n} must be divisible by tiles tm={tm}, tk={tk}, tm_lin={tm_lin}")

    # ---- pass 1: support (N x d_out, bf16), computed once -------------------
    # TODO(synk): for very large d_in*d_out on v7x, tile W over a d_out grid axis
    # instead of keeping the full (double-buffered) W resident.
    support = pl.pallas_call(
        linear_kernel,
        out_shape=jax.ShapeDtypeStruct((n, d_out), compute_dtype),
        grid_spec=pltpu.PrefetchScalarGridSpec(
            num_scalar_prefetch=0,
            grid=(n // tm_lin,),
            in_specs=[
                pl.BlockSpec((tm_lin, d_in), lambda i: (i, 0)),   # x rows
                pl.BlockSpec((d_in, d_out), lambda i: (0, 0)),    # W^T (resident)
                pl.BlockSpec((1, d_out), lambda i: (0, 0)),       # bias
            ],
            out_specs=pl.BlockSpec((tm_lin, d_out), lambda i: (i, 0)),
        ),
        compiler_params=pltpu.CompilerParams(
            dimension_semantics=("parallel",),
            vmem_limit_bytes=vmem_limit,
        ),
    )(xc, wt, b2)

    # ---- pass 2: out = adj @ support (HBM-bound on adj) ---------------------
    if out_dtype == jnp.float32:
        kernel = functools.partial(aggregate_f32_kernel, tk=tk)
        scratch = []
    else:
        kernel = functools.partial(aggregate_cast_kernel, tk=tk)
        scratch = [pltpu.VMEM((tm, d_out), jnp.float32)]

    out = pl.pallas_call(
        kernel,
        out_shape=jax.ShapeDtypeStruct((n, d_out), out_dtype),
        grid_spec=pltpu.PrefetchScalarGridSpec(
            num_scalar_prefetch=0,
            grid=(n // tm, n // tk),
            in_specs=[
                pl.BlockSpec((tm, tk), lambda i, k: (i, k)),      # adj tile (int8)
                pl.BlockSpec((n, d_out), lambda i, k: (0, 0)),    # support, VMEM-resident
            ],
            out_specs=pl.BlockSpec((tm, d_out), lambda i, k: (i, 0)),
            scratch_shapes=scratch,
        ),
        compiler_params=pltpu.CompilerParams(
            dimension_semantics=("parallel", "arbitrary"),
            vmem_limit_bytes=vmem_limit,
        ),
    )(adjc, support)

    # TODO(synk): training-mode dropout (p=0.1) omitted — eval-mode dropout is identity.
    return out


if __name__ == "__main__":
    key = jax.random.PRNGKey(0)
    k_x, k_adj, k_w, k_b = jax.random.split(key, 4)

    # Small but lane-dense / MXU-friendly shapes (d_in, d_out multiples of 128).
    num_nodes, input_dim, output_dim = 512, 128, 128

    x = jax.random.normal(k_x, (num_nodes, input_dim), dtype=jnp.float32)
    adj = (jax.random.uniform(k_adj, (num_nodes, num_nodes)) > 0.5).astype(jnp.float32)

    # Deterministic nn.Linear-style init: U(-1/sqrt(fan_in), 1/sqrt(fan_in)).
    bound = 1.0 / jnp.sqrt(jnp.float32(input_dim))
    weight = jax.random.uniform(k_w, (output_dim, input_dim), dtype=jnp.float32,
                                minval=-bound, maxval=bound)
    bias = jax.random.uniform(k_b, (output_dim,), dtype=jnp.float32,
                              minval=-bound, maxval=bound)

    # Main run: default tiles.  For N=512 the whole problem fits in VMEM, so the
    # defaults pick tm=tk=512 -> a single grid step (no per-step overhead).
    out = graph_convolution(x, adj, weight, bias)
    out = jax.block_until_ready(out)

    # Tiled run (256-aligned) to exercise the multi-step resident-accumulator path.
    out_tiled = graph_convolution(x, adj, weight, bias, tm=256, tk=256)
    out_tiled = jax.block_until_ready(out_tiled)

    # Reference matching the kernel's bf16-operand / f32-accumulate numerics.
    xb = x.astype(jnp.bfloat16)
    wb = weight.astype(jnp.bfloat16)
    adjb = adj.astype(jnp.bfloat16)
    sup_ref = (jnp.dot(xb, wb.T, preferred_element_type=jnp.float32)
               + bias).astype(jnp.bfloat16)
    ref_bf16 = jnp.dot(adjb, sup_ref, preferred_element_type=jnp.float32)

    # Pure-f32 reference of the original module (loose tolerance for bf16 rounding).
    ref_f32 = adj @ (x @ weight.T + bias)

    assert out.shape == (num_nodes, output_dim)
    assert out.dtype == x.dtype
    assert jnp.allclose(out, out_tiled, atol=1e-3, rtol=1e-3)
    assert jnp.allclose(out, ref_bf16, atol=1e-3, rtol=1e-3)
    assert jnp.allclose(out, ref_f32, atol=0.5, rtol=0.05)

    print("KERNEL_OK")
</pallas_src>

<mosaic_0001>
module attributes {stable_mosaic.version = 11 : i64} {
  func.func @linear_kernel(%arg0: i32, %arg1: memref<512x128xbf16, #tpu.memory_space<vmem>>, %arg2: memref<128x128xbf16, #tpu.memory_space<vmem>>, %arg3: memref<1x128xf32, #tpu.memory_space<vmem>>, %arg4: memref<512x128xbf16, #tpu.memory_space<vmem>>) attributes {dimension_semantics = [#tpu.dimension_semantics<parallel>], iteration_bounds = array<i64: 1>, scalar_prefetch = 0 : i64, scratch_operands = 0 : i64, tpu.core_type = #tpu.core_type<tc>, window_params = [{transform_indices = @transform_0, window_bounds = array<i64: 512, 128>}, {pipeline_mode = #tpu.pipeline_mode<synchronous>, transform_indices = @transform_1, window_bounds = array<i64: 128, 128>}, {pipeline_mode = #tpu.pipeline_mode<synchronous>, transform_indices = @transform_2, window_bounds = array<i64: 1, 128>}, {transform_indices = @transform_3, window_bounds = array<i64: 512, 128>}]} {
    %c0 = arith.constant 0 : index
    %c0_0 = arith.constant 0 : index
    %0 = vector.load %arg1[%c0, %c0_0] : memref<512x128xbf16, #tpu.memory_space<vmem>>, vector<512x128xbf16>
    %c0_1 = arith.constant 0 : index
    %c0_2 = arith.constant 0 : index
    %1 = vector.load %arg2[%c0_1, %c0_2] : memref<128x128xbf16, #tpu.memory_space<vmem>>, vector<128x128xbf16>
    %cst = arith.constant dense<0.000000e+00> : vector<512x128xf32>
    %2 = tpu.matmul %0, %1, %cst {dimension_numbers = #tpu.dot_dimension_numbers<[1], [0], [0], [1], [0, 0, 1, 1], [], []>} : vector<512x128xbf16>, vector<128x128xbf16>, vector<512x128xf32> -> vector<512x128xf32>
    %c0_3 = arith.constant 0 : index
    %c0_4 = arith.constant 0 : index
    %3 = vector.load %arg3[%c0_3, %c0_4] : memref<1x128xf32, #tpu.memory_space<vmem>>, vector<1x128xf32>
    %4 = vector.broadcast %3 : vector<1x128xf32> to vector<512x128xf32>
    %5 = arith.addf %2, %4 : vector<512x128xf32>
    %6 = arith.truncf %5 : vector<512x128xf32> to vector<512x128xbf16>
    %c0_5 = arith.constant 0 : index
    %c0_6 = arith.constant 0 : index
    %7 = vector.load %arg4[%c0_5, %c0_6] : memref<512x128xbf16, #tpu.memory_space<vmem>>, vector<512x128xbf16>
    tpu.vector_store %arg4[%c0_5, %c0_6], %6 {strides = array<i32>} : memref<512x128xbf16, #tpu.memory_space<vmem>>, vector<512x128xbf16>,
    return
  }
  func.func @transform_0(%arg0: i32) -> (i32, i32) {
    %c0_i32 = arith.constant 0 : i32
    %c0_i32_0 = arith.constant 0 : i32
    return %arg0, %c0_i32 : i32, i32
  }
  func.func @transform_1(%arg0: i32) -> (i32, i32) {
    %c0_i32 = arith.constant 0 : i32
    %c0_i32_0 = arith.constant 0 : i32
    %c0_i32_1 = arith.constant 0 : i32
    return %c0_i32, %c0_i32_0 : i32, i32
  }
  func.func @transform_2(%arg0: i32) -> (i32, i32) {
    %c0_i32 = arith.constant 0 : i32
    %c0_i32_0 = arith.constant 0 : i32
    %c0_i32_1 = arith.constant 0 : i32
    return %c0_i32, %c0_i32_0 : i32, i32
  }
  func.func @transform_3(%arg0: i32) -> (i32, i32) {
    %c0_i32 = arith.constant 0 : i32
    %c0_i32_0 = arith.constant 0 : i32
    return %arg0, %c0_i32 : i32, i32
  }
}

</mosaic_0001>

<bundles_post_ra>
// kernel: tpu_custom_call.1
= control target key start
LH: loop header
LB: loop body
LE: loop exit
PB: predicated region body
PF: predicated region fallthrough
CT: control target
= control target key end

     0   :  { %8 = vsyncpa [#allocation3], 0  ;;  %s1750_s0 = inlined_call_operand.hbm [shape: bf16[512,128], index: 0, kind: input, shape index: {}]   ;;  %s1751_s1 = inlined_call_operand.hbm [shape: bf16[128,128], index: 1, kind: input, shape index: {}]   ;;  %s1752_s2 = inlined_call_operand.vmem [shape: f32[1,128], index: 2, kind: input, shape index: {}]   ;;  %s1753_s3 = inlined_call_operand.hbm [shape: bf16[512,128], index: 3, kind: output, shape index: {}]  }
   0x1   :  { %9 = vsyncpa [#allocation6], 0 }
   0x2   :  { %10 = vsyncpa [#allocation4], 0  ;;  %s1611_s12 = smov [#allocation2]   ;;  %s1539_s16 = scalar_lea.hbm %s1750_s0, 4096 }
   0x3   :  { %s16_s13 = sshll.u32 %s1611_s12, 4  ;;  %p1540_p0 = scmp.ne.s32.totalorder %s1750_s0, %s1539_s16  ;;  %s17_s13 = int_to_ptr.vmem [resolvable:$true] %s16_s13 }
   0x4   :  { %p1543_p1 = scmp.lt.u32.totalorder %s1539_s16, %s1750_s0 }
   0x6   :  { %p1545_p2 = pnand %p1543_p1, %p1540_p0 }
   0x8   :  { %1548 = shalt.err (!%p1545_p2)
}
   0x9   :  { %s1549_s21 = scalar_lea.vmem %s17_s13, 4096  ;;  %p1554_p4 = scmp.lt.s32.totalorder %s17_s13, %s17_s13 }
   0xa   :  { %p1550_p3 = scmp.ne.s32.totalorder %s17_s13, %s1549_s21  ;;  %p1555_p5 = scmp.lt.s32.totalorder %s1549_s21, %s1549_s21 }
   0xc   :  { %p1556_p6 = por %p1555_p5, %p1554_p4 }
   0xe   :  { %p1557_p7 = pnand %p1556_p6, %p1550_p3 }
  0x10   :  { %1560 = shalt.err (!%p1557_p7)
}
  0x11   :  { %s1612_s22 = smov 64   ;;  %s1613_s23 = smov 4  }
  0x12   :  { %22 = dma.hbm_to_vmem [thread:$0]  %s1750_s0, 4096, %s17_s13, [#allocation3], %s1612_s22, %s1612_s22, %s1613_s23  }
  0x13   :  { %s1614_s26 = smov [#allocation5]   ;;  %s1561_s30 = scalar_lea.hbm %s1751_s1, 1024 }
  0x14   :  { %s28_s27 = sshll.u32 %s1614_s26, 4  ;;  %p1562_p8 = scmp.ne.s32.totalorder %s1751_s1, %s1561_s30  ;;  %s29_s27 = int_to_ptr.vmem [resolvable:$true] %s28_s27 }
  0x15   :  { %p1565_p9 = scmp.lt.u32.totalorder %s1561_s30, %s1751_s1 }
  0x17   :  { %p1567_p10 = pnand %p1565_p9, %p1562_p8 }
  0x19   :  { %1570 = shalt.err (!%p1567_p10)
}
  0x1a   :  { %s1571_s8 = scalar_lea.vmem %s29_s27, 1024  ;;  %p1576_p12 = scmp.lt.s32.totalorder %s29_s27, %s29_s27 }
  0x1b   :  { %p1572_p11 = scmp.ne.s32.totalorder %s29_s27, %s1571_s8  ;;  %p1577_p13 = scmp.lt.s32.totalorder %s1571_s8, %s1571_s8 }
  0x1d   :  { %p1578_p0 = por %p1577_p13, %p1576_p12 }
  0x1f   :  { %p1579_p1 = pnand %p1578_p0, %p1572_p11 }
  0x21   :  { %1582 = shalt.err (!%p1579_p1)
}
  0x22   :  { %34 = dma.hbm_to_vmem [thread:$0]  %s1751_s1, 1024, %s29_s27, [#allocation6], %s1612_s22, %s1612_s22, %s1613_s23  }
  0x23   :  { %1605 = dma.done.wait [#allocation3], 4096  }
  0x24   :  { %1606 = vsyncadd [#allocation3], 4294963200 }
  0x25   :  { %1607 = dma.done.wait [#allocation6], 1024  }
  0x26   :  { %1608 = vsyncadd [#allocation6], 4294966272  ;;  %v1499_v0 = vld [vmem:[#allocation5] sm:$0xff]   ;;  %v1500_v1 = vld [vmem:[#allocation5 + $0x8] sm:$0xff]  }
  0x27   :  { %1398 = vmatprep.subr.bf16.mxu0 %v1499_v0  ;;  %1478 = vmatprep.subr.bf16.mxu1 %v1499_v0  ;;  %v1501_v2 = vld [vmem:[#allocation5 + $0x10] sm:$0xff]   ;;  %v1502_v3 = vld [vmem:[#allocation5 + $0x18] sm:$0xff]   ;;  %v1507_v4 = vld [vmem:[#allocation2] sm:$0xff]  }
  0x28   :  { %1399 = vmatpush3.bf16.msra.mxu0 %v1499_v0  ;;  %1486 = vmatpush3.bf16.msra.mxu1 %v1499_v0  ;;  %v1508_v5 = vld [vmem:[#allocation2 + $0x80] sm:$0xff]   ;;  %v1504_v7 = vld [vmem:[#allocation5 + $0x28] sm:$0xff]   ;;  %v1505_v8 = vld [vmem:[#allocation5 + $0x30] sm:$0xff]  }
  0x29   :  { %1400 = vmatprep.subr.bf16.mxu0 %v1500_v1  ;;  %1479 = vmatprep.subr.bf16.mxu1 %v1500_v1  ;;  %v1503_v6 = vld [vmem:[#allocation5 + $0x20] sm:$0xff]   ;;  %v1506_v9 = vld [vmem:[#allocation5 + $0x38] sm:$0xff]   ;;  %v1509_v10 = vld [vmem:[#allocation2 + $0x8] sm:$0xff]  }
  0x2a   :  { %1414 = vmatprep.mubr.bf16.mxu0 %v1507_v4  ;;  %1446 = vmatprep.mubr.bf16.mxu1 %v1508_v5  ;;  %v1510_v11 = vld [vmem:[#allocation2 + $0x88] sm:$0xff]   ;;  %v1511_v12 = vld [vmem:[#allocation2 + $0x10] sm:$0xff]   ;;  %v1513_v14 = vld [vmem:[#allocation2 + $0x18] sm:$0xff]  }
  0x2b   :  { %v1512_v13 = vld [vmem:[#allocation2 + $0x90] sm:$0xff]   ;;  %v1514_v15 = vld [vmem:[#allocation2 + $0x98] sm:$0xff]   ;;  %v1515_v16 = vld [vmem:[#allocation2 + $0x20] sm:$0xff]  }
  0x2c   :  { %1401 = vmatpush3.bf16.msra.mxu0 %v1500_v1  ;;  %1487 = vmatpush3.bf16.msra.mxu1 %v1500_v1  ;;  %v1516_v17 = vld [vmem:[#allocation2 + $0xa0] sm:$0xff]   ;;  %v1517_v18 = vld [vmem:[#allocation2 + $0x28] sm:$0xff]   ;;  %v1519_v20 = vld [vmem:[#allocation2 + $0x30] sm:$0xff]  }
  0x2d   :  { %1402 = vmatprep.subr.bf16.mxu0 %v1501_v2  ;;  %1480 = vmatprep.subr.bf16.mxu1 %v1501_v2  ;;  %v1518_v19 = vld [vmem:[#allocation2 + $0xa8] sm:$0xff]   ;;  %v1520_v21 = vld [vmem:[#allocation2 + $0xb0] sm:$0xff]   ;;  %v1521_v22 = vld [vmem:[#allocation2 + $0x38] sm:$0xff]  }
  0x2e   :  { %v1522_v23 = vld [vmem:[#allocation2 + $0xb8] sm:$0xff]   ;;  %v1523_v24 = vld [vmem:[#allocation2 + $0x40] sm:$0xff]   ;;  %v1525_v26 = vld [vmem:[#allocation2 + $0x48] sm:$0xff]  }
  0x2f   :  { %v1524_v25 = vld [vmem:[#allocation2 + $0xc0] sm:$0xff]   ;;  %v1526_v27 = vld [vmem:[#allocation2 + $0xc8] sm:$0xff]   ;;  %v1527_v28 = vld [vmem:[#allocation2 + $0x50] sm:$0xff]  }
  0x30   :  { %1403 = vmatpush3.bf16.msra.mxu0 %v1501_v2  ;;  %1488 = vmatpush3.bf16.msra.mxu1 %v1501_v2  ;;  %v1528_v29 = vld [vmem:[#allocation2 + $0xd0] sm:$0xff]   ;;  %v1529_v30 = vld [vmem:[#allocation2 + $0x58] sm:$0xff]   ;;  %v1531_v32 = vld [vmem:[#allocation2 + $0x60] sm:$0xff]  }
  0x31   :  { %1404 = vmatprep.subr.bf16.mxu0 %v1502_v3  ;;  %1481 = vmatprep.subr.bf16.mxu1 %v1502_v3  ;;  %v1530_v31 = vld [vmem:[#allocation2 + $0xd8] sm:$0xff]   ;;  %v1532_v33 = vld [vmem:[#allocation2 + $0xe0] sm:$0xff]   ;;  %v1533_v34 = vld [vmem:[#allocation2 + $0x68] sm:$0xff]  }
  0x32   :  { %v1534_v35 = vld [vmem:[#allocation2 + $0xe8] sm:$0xff]   ;;  %v1535_v36 = vld [vmem:[#allocation2 + $0x70] sm:$0xff]   ;;  %v1537_v38 = vld [vmem:[#allocation2 + $0x78] sm:$0xff]  }
  0x33   :  { %v1536_v37 = vld [vmem:[#allocation2 + $0xf0] sm:$0xff]   ;;  %v1538_v39 = vld [vmem:[#allocation2 + $0xf8] sm:$0xff]   ;;  %v1669_v41 = vld [vmem:[%s1752_s2] ss:$0 sm:$0xff]  ;;  %s1615_s2 = smov [#allocation7]  }
  0x34   :  { %1405 = vmatpush3.bf16.msra.mxu0 %v1502_v3  ;;  %1489 = vmatpush3.bf16.msra.mxu1 %v1502_v3  ;;  %s985_s11 = sshll.u32 %s1615_s2, 4  ;;  %s986_s11 = int_to_ptr.vmem [resolvable:$true] %s985_s11 }
  0x35   :  { %1406 = vmatprep.subr.bf16.mxu0 %v1503_v6  ;;  %1482 = vmatprep.subr.bf16.mxu1 %v1503_v6  ;;  %s1583_s12 = scalar_lea.vmem %s986_s11, 4096  ;;  %p1588_p3 = scmp.lt.s32.totalorder %s986_s11, %s986_s11 }
  0x36   :  { %p1584_p2 = scmp.ne.s32.totalorder %s986_s11, %s1583_s12  ;;  %p1589_p4 = scmp.lt.s32.totalorder %s1583_s12, %s1583_s12 }
  0x38   :  { %1407 = vmatpush3.bf16.msra.mxu0 %v1503_v6  ;;  %1490 = vmatpush3.bf16.msra.mxu1 %v1503_v6  ;;  %p1590_p5 = por %p1589_p4, %p1588_p3 }
  0x39   :  { %1408 = vmatprep.subr.bf16.mxu0 %v1504_v7  ;;  %1483 = vmatprep.subr.bf16.mxu1 %v1504_v7 }
  0x3a   :  { %p1591_p6 = pnand %p1590_p5, %p1584_p2 }
  0x3c   :  { %1409 = vmatpush3.bf16.msra.mxu0 %v1504_v7  ;;  %1491 = vmatpush3.bf16.msra.mxu1 %v1504_v7 }
  0x3d   :  { %1410 = vmatprep.subr.bf16.mxu0 %v1505_v8  ;;  %1484 = vmatprep.subr.bf16.mxu1 %v1505_v8 }
  0x40   :  { %1411 = vmatpush3.bf16.msra.mxu0 %v1505_v8  ;;  %1492 = vmatpush3.bf16.msra.mxu1 %v1505_v8 }
  0x41   :  { %1412 = vmatprep.subr.bf16.mxu0 %v1506_v9  ;;  %1485 = vmatprep.subr.bf16.mxu1 %v1506_v9 }
  0x44   :  { %1413 = vmatpush3.bf16.msra.mxu0 %v1506_v9  ;;  %1493 = vmatpush3.bf16.msra.mxu1 %v1506_v9 }
  0x47   :  { %1415 = vmatmul.mubr.bf16.vlgmr.msra.gmra.mrb[0].mxu0 %v1509_v10  ;;  %1447 = vmatmul.mubr.bf16.vlgmr.msra.gmra.mrb[0].mxu1 %v1510_v11 }
  0x48   :  { %1418 = vmatprep.mubr.bf16.mxu0 %v1511_v12  ;;  %1450 = vmatprep.mubr.bf16.mxu1 %v1512_v13 }
  0x4f   :  { %1419 = vmatmul.mubr.bf16.gmra.mrb[4].mxu0 %v1513_v14  ;;  %1451 = vmatmul.mubr.bf16.gmra.mrb[4].mxu1 %v1514_v15 }
  0x50   :  { %1422 = vmatprep.mubr.bf16.mxu0 %v1515_v16  ;;  %1454 = vmatprep.mubr.bf16.mxu1 %v1516_v17 }
  0x57   :  { %1423 = vmatmul.mubr.bf16.gmra.mrb[8].mxu0 %v1517_v18  ;;  %1455 = vmatmul.mubr.bf16.gmra.mrb[8].mxu1 %v1518_v19 }
  0x58   :  { %1426 = vmatprep.mubr.bf16.mxu0 %v1519_v20  ;;  %1458 = vmatprep.mubr.bf16.mxu1 %v1520_v21 }
  0x5f   :  { %1427 = vmatmul.mubr.bf16.gmra.mrb[12].mxu0 %v1521_v22  ;;  %1459 = vmatmul.mubr.bf16.gmra.mrb[12].mxu1 %v1522_v23 }
  0x60   :  { %1430 = vmatprep.mubr.bf16.mxu0 %v1523_v24  ;;  %1462 = vmatprep.mubr.bf16.mxu1 %v1524_v25 }
  0x67   :  { %1431 = vmatmul.mubr.bf16.gmra.mrb[16].mxu0 %v1525_v26  ;;  %1463 = vmatmul.mubr.bf16.gmra.mrb[16].mxu1 %v1526_v27 }
  0x68   :  { %1434 = vmatprep.mubr.bf16.mxu0 %v1527_v28  ;;  %1466 = vmatprep.mubr.bf16.mxu1 %v1528_v29 }
  0x6f   :  { %1435 = vmatmul.mubr.bf16.gmra.mrb[20].mxu0 %v1529_v30  ;;  %1467 = vmatmul.mubr.bf16.gmra.mrb[20].mxu1 %v1530_v31 }
  0x70   :  { %1438 = vmatprep.mubr.bf16.mxu0 %v1531_v32  ;;  %1470 = vmatprep.mubr.bf16.mxu1 %v1532_v33 }
  0x77   :  { %1439 = vmatmul.mubr.bf16.gmra.mrb[24].mxu0 %v1533_v34  ;;  %1471 = vmatmul.mubr.bf16.gmra.mrb[24].mxu1 %v1534_v35 }
  0x78   :  { %1442 = vmatprep.mubr.bf16.mxu0 %v1535_v36  ;;  %1474 = vmatprep.mubr.bf16.mxu1 %v1536_v37 }
  0x7f   :  { %1443 = vmatmul.mubr.bf16.gmra.mrb[28].mxu0 %v1537_v38  ;;  %1475 = vmatmul.mubr.bf16.gmra.mrb[28].mxu1 %v1538_v39 }
 0x11a   :  { %v1416_v40 = vpop.f32.mrb[0].mxu0  ;;  %v1448_v42 = vpop.f32.mrb[0].mxu1 }
 0x11b   :  { %v405_v43 = vpop.f32.mrb[1].mxu0  ;;  %v533_v44 = vpop.f32.mrb[1].mxu1  ;;  %v414_v47 = vadd.f32 %v1416_v40, %v1669_v41  ;;  %v542_v48 = vadd.f32 %v1448_v42, %v1669_v41 }
 0x11c   :  { %v1417_v45 = vpop.f32.mrb[2].mxu0  ;;  %v1449_v46 = vpop.f32.mrb[2].mxu1  ;;  %v406_v53 = vadd.f32 %v1669_v41, %v405_v43  ;;  %v534_v54 = vadd.f32 %v1669_v41, %v533_v44 }
 0x11d   :  { %v417_v49 = vadd.f32 %v1417_v45, %v1669_v41  ;;  %v545_v50 = vadd.f32 %v1449_v46, %v1669_v41  ;;  %v408_v51 = vpop.f32.mrb[3].mxu0  ;;  %v536_v52 = vpop.f32.mrb[3].mxu1 }
 0x11e   :  { %v409_v55 = vadd.f32 %v1669_v41, %v408_v51  ;;  %v537_v56 = vadd.f32 %v1669_v41, %v536_v52 }
 0x11f   :  { %v1175_v57 = vpack.c.bf16 %v417_v49, %v414_v47  ;;  %v1255_v58 = vpack.c.bf16 %v545_v50, %v542_v48 }
 0x120   :  { %v1170_v59 = vpack.c.bf16 %v409_v55, %v406_v53  ;;  %v1250_v60 = vpack.c.bf16 %v537_v56, %v534_v54 }
 0x121   :  { %1327 = vst [vmem:[#allocation7 + $0x8] sm:$0xff] %v1175_v57   ;;  %1343 = vst [vmem:[#allocation7 + $0x88] sm:$0xff] %v1255_v58  }
 0x122   :  { %1171 = vst [vmem:[#allocation7] sm:$0xff] %v1170_v59   ;;  %1342 = vst [vmem:[#allocation7 + $0x80] sm:$0xff] %v1250_v60   ;;  %v1420_v61 = vpop.f32.mrb[4].mxu0  ;;  %v1452_v62 = vpop.f32.mrb[4].mxu1 }
 0x123   :  { %v421_v63 = vpop.f32.mrb[5].mxu0  ;;  %v549_v0 = vpop.f32.mrb[5].mxu1  ;;  %v430_v3 = vadd.f32 %v1420_v61, %v1669_v41  ;;  %v558_v4 = vadd.f32 %v1452_v62, %v1669_v41 }
 0x124   :  { %v1421_v1 = vpop.f32.mrb[6].mxu0  ;;  %v1453_v2 = vpop.f32.mrb[6].mxu1  ;;  %v422_v9 = vadd.f32 %v1669_v41, %v421_v63  ;;  %v550_v10 = vadd.f32 %v1669_v41, %v549_v0 }
 0x125   :  { %v433_v5 = vadd.f32 %v1421_v1, %v1669_v41  ;;  %v561_v6 = vadd.f32 %v1453_v2, %v1669_v41  ;;  %v424_v7 = vpop.f32.mrb[7].mxu0  ;;  %v552_v8 = vpop.f32.mrb[7].mxu1 }
 0x126   :  { %v425_v11 = vadd.f32 %v1669_v41, %v424_v7  ;;  %v553_v12 = vadd.f32 %v1669_v41, %v552_v8 }
 0x127   :  { %v1185_v13 = vpack.c.bf16 %v433_v5, %v430_v3  ;;  %v1265_v14 = vpack.c.bf16 %v561_v6, %v558_v4 }
 0x128   :  { %v1180_v15 = vpack.c.bf16 %v425_v11, %v422_v9  ;;  %v1260_v16 = vpack.c.bf16 %v553_v12, %v550_v10 }
 0x129   :  { %1329 = vst [vmem:[#allocation7 + $0x18] sm:$0xff] %v1185_v13   ;;  %1345 = vst [vmem:[#allocation7 + $0x98] sm:$0xff] %v1265_v14  }
 0x12a   :  { %1328 = vst [vmem:[#allocation7 + $0x10] sm:$0xff] %v1180_v15   ;;  %1344 = vst [vmem:[#allocation7 + $0x90] sm:$0xff] %v1260_v16   ;;  %v1424_v17 = vpop.f32.mrb[8].mxu0  ;;  %v1456_v18 = vpop.f32.mrb[8].mxu1 }
 0x12b   :  { %v437_v19 = vpop.f32.mrb[9].mxu0  ;;  %v565_v20 = vpop.f32.mrb[9].mxu1  ;;  %v446_v23 = vadd.f32 %v1424_v17, %v1669_v41  ;;  %v574_v24 = vadd.f32 %v1456_v18, %v1669_v41 }
 0x12c   :  { %v1425_v21 = vpop.f32.mrb[10].mxu0  ;;  %v1457_v22 = vpop.f32.mrb[10].mxu1  ;;  %v438_v29 = vadd.f32 %v1669_v41, %v437_v19  ;;  %v566_v30 = vadd.f32 %v1669_v41, %v565_v20 }
 0x12d   :  { %v449_v25 = vadd.f32 %v1425_v21, %v1669_v41  ;;  %v577_v26 = vadd.f32 %v1457_v22, %v1669_v41  ;;  %v440_v27 = vpop.f32.mrb[11].mxu0  ;;  %v568_v28 = vpop.f32.mrb[11].mxu1 }
 0x12e   :  { %v441_v31 = vadd.f32 %v1669_v41, %v440_v27  ;;  %v569_v32 = vadd.f32 %v1669_v41, %v568_v28 }
 0x12f   :  { %v1195_v33 = vpack.c.bf16 %v449_v25, %v446_v23  ;;  %v1275_v34 = vpack.c.bf16 %v577_v26, %v574_v24 }
 0x130   :  { %v1190_v35 = vpack.c.bf16 %v441_v31, %v438_v29  ;;  %v1270_v36 = vpack.c.bf16 %v569_v32, %v566_v30 }
 0x131   :  { %1331 = vst [vmem:[#allocation7 + $0x28] sm:$0xff] %v1195_v33   ;;  %1347 = vst [vmem:[#allocation7 + $0xa8] sm:$0xff] %v1275_v34  }
 0x132   :  { %1330 = vst [vmem:[#allocation7 + $0x20] sm:$0xff] %v1190_v35   ;;  %1346 = vst [vmem:[#allocation7 + $0xa0] sm:$0xff] %v1270_v36   ;;  %v1428_v37 = vpop.f32.mrb[12].mxu0  ;;  %v1460_v38 = vpop.f32.mrb[12].mxu1 }
 0x133   :  { %v453_v39 = vpop.f32.mrb[13].mxu0  ;;  %v581_v40 = vpop.f32.mrb[13].mxu1  ;;  %v462_v44 = vadd.f32 %v1428_v37, %v1669_v41  ;;  %v590_v45 = vadd.f32 %v1460_v38, %v1669_v41 }
 0x134   :  { %v1429_v42 = vpop.f32.mrb[14].mxu0  ;;  %v1461_v43 = vpop.f32.mrb[14].mxu1  ;;  %v454_v50 = vadd.f32 %v1669_v41, %v453_v39  ;;  %v582_v51 = vadd.f32 %v1669_v41, %v581_v40 }
 0x135   :  { %v465_v46 = vadd.f32 %v1429_v42, %v1669_v41  ;;  %v593_v47 = vadd.f32 %v1461_v43, %v1669_v41  ;;  %v456_v48 = vpop.f32.mrb[15].mxu0  ;;  %v584_v49 = vpop.f32.mrb[15].mxu1 }
 0x136   :  { %v457_v52 = vadd.f32 %v1669_v41, %v456_v48  ;;  %v585_v53 = vadd.f32 %v1669_v41, %v584_v49 }
 0x137   :  { %v1205_v54 = vpack.c.bf16 %v465_v46, %v462_v44  ;;  %v1285_v55 = vpack.c.bf16 %v593_v47, %v590_v45 }
 0x138   :  { %v1200_v56 = vpack.c.bf16 %v457_v52, %v454_v50  ;;  %v1280_v57 = vpack.c.bf16 %v585_v53, %v582_v51 }
 0x139   :  { %1333 = vst [vmem:[#allocation7 + $0x38] sm:$0xff] %v1205_v54   ;;  %1349 = vst [vmem:[#allocation7 + $0xb8] sm:$0xff] %v1285_v55  }
 0x13a   :  { %1332 = vst [vmem:[#allocation7 + $0x30] sm:$0xff] %v1200_v56   ;;  %1348 = vst [vmem:[#allocation7 + $0xb0] sm:$0xff] %v1280_v57   ;;  %v1432_v58 = vpop.f32.mrb[16].mxu0  ;;  %v1464_v59 = vpop.f32.mrb[16].mxu1 }
 0x13b   :  { %v469_v60 = vpop.f32.mrb[17].mxu0  ;;  %v597_v61 = vpop.f32.mrb[17].mxu1  ;;  %v478_v0 = vadd.f32 %v1432_v58, %v1669_v41  ;;  %v606_v1 = vadd.f32 %v1464_v59, %v1669_v41 }
 0x13c   :  { %v1433_v62 = vpop.f32.mrb[18].mxu0  ;;  %v1465_v63 = vpop.f32.mrb[18].mxu1  ;;  %v470_v6 = vadd.f32 %v1669_v41, %v469_v60  ;;  %v598_v7 = vadd.f32 %v1669_v41, %v597_v61 }
 0x13d   :  { %v481_v2 = vadd.f32 %v1433_v62, %v1669_v41  ;;  %v609_v3 = vadd.f32 %v1465_v63, %v1669_v41  ;;  %v472_v4 = vpop.f32.mrb[19].mxu0  ;;  %v600_v5 = vpop.f32.mrb[19].mxu1 }
 0x13e   :  { %v473_v8 = vadd.f32 %v1669_v41, %v472_v4  ;;  %v601_v9 = vadd.f32 %v1669_v41, %v600_v5 }
 0x13f   :  { %v1215_v10 = vpack.c.bf16 %v481_v2, %v478_v0  ;;  %v1295_v11 = vpack.c.bf16 %v609_v3, %v606_v1 }
 0x140   :  { %v1210_v12 = vpack.c.bf16 %v473_v8, %v470_v6  ;;  %v1290_v13 = vpack.c.bf16 %v601_v9, %v598_v7 }
 0x141   :  { %1335 = vst [vmem:[#allocation7 + $0x48] sm:$0xff] %v1215_v10   ;;  %1351 = vst [vmem:[#allocation7 + $0xc8] sm:$0xff] %v1295_v11  }
 0x142   :  { %1334 = vst [vmem:[#allocation7 + $0x40] sm:$0xff] %v1210_v12   ;;  %1350 = vst [vmem:[#allocation7 + $0xc0] sm:$0xff] %v1290_v13   ;;  %v1436_v14 = vpop.f32.mrb[20].mxu0  ;;  %v1468_v15 = vpop.f32.mrb[20].mxu1 }
 0x143   :  { %v485_v16 = vpop.f32.mrb[21].mxu0  ;;  %v613_v17 = vpop.f32.mrb[21].mxu1  ;;  %v494_v20 = vadd.f32 %v1436_v14, %v1669_v41  ;;  %v622_v21 = vadd.f32 %v1468_v15, %v1669_v41 }
 0x144   :  { %v1437_v18 = vpop.f32.mrb[22].mxu0  ;;  %v1469_v19 = vpop.f32.mrb[22].mxu1  ;;  %v486_v26 = vadd.f32 %v1669_v41, %v485_v16  ;;  %v614_v27 = vadd.f32 %v1669_v41, %v613_v17 }
 0x145   :  { %v497_v22 = vadd.f32 %v1437_v18, %v1669_v41  ;;  %v625_v23 = vadd.f32 %v1469_v19, %v1669_v41  ;;  %v488_v24 = vpop.f32.mrb[23].mxu0  ;;  %v616_v25 = vpop.f32.mrb[23].mxu1 }
 0x146   :  { %v489_v28 = vadd.f32 %v1669_v41, %v488_v24  ;;  %v617_v29 = vadd.f32 %v1669_v41, %v616_v25 }
 0x147   :  { %v1225_v30 = vpack.c.bf16 %v497_v22, %v494_v20  ;;  %v1305_v31 = vpack.c.bf16 %v625_v23, %v622_v21 }
 0x148   :  { %v1220_v32 = vpack.c.bf16 %v489_v28, %v486_v26  ;;  %v1300_v33 = vpack.c.bf16 %v617_v29, %v614_v27 }
 0x149   :  { %1337 = vst [vmem:[#allocation7 + $0x58] sm:$0xff] %v1225_v30   ;;  %1353 = vst [vmem:[#allocation7 + $0xd8] sm:$0xff] %v1305_v31  }
 0x14a   :  { %1336 = vst [vmem:[#allocation7 + $0x50] sm:$0xff] %v1220_v32   ;;  %1352 = vst [vmem:[#allocation7 + $0xd0] sm:$0xff] %v1300_v33   ;;  %v1440_v34 = vpop.f32.mrb[24].mxu0  ;;  %v1472_v35 = vpop.f32.mrb[24].mxu1 }
 0x14b   :  { %v501_v36 = vpop.f32.mrb[25].mxu0  ;;  %v629_v37 = vpop.f32.mrb[25].mxu1  ;;  %v510_v40 = vadd.f32 %v1440_v34, %v1669_v41  ;;  %v638_v42 = vadd.f32 %v1472_v35, %v1669_v41 }
 0x14c   :  { %v1441_v38 = vpop.f32.mrb[26].mxu0  ;;  %v1473_v39 = vpop.f32.mrb[26].mxu1  ;;  %v502_v47 = vadd.f32 %v1669_v41, %v501_v36  ;;  %v630_v48 = vadd.f32 %v1669_v41, %v629_v37 }
 0x14d   :  { %v513_v43 = vadd.f32 %v1441_v38, %v1669_v41  ;;  %v641_v44 = vadd.f32 %v1473_v39, %v1669_v41  ;;  %v504_v45 = vpop.f32.mrb[27].mxu0  ;;  %v632_v46 = vpop.f32.mrb[27].mxu1 }
 0x14e   :  { %v505_v49 = vadd.f32 %v1669_v41, %v504_v45  ;;  %v633_v50 = vadd.f32 %v1669_v41, %v632_v46 }
 0x14f   :  { %v1235_v51 = vpack.c.bf16 %v513_v43, %v510_v40  ;;  %v1315_v52 = vpack.c.bf16 %v641_v44, %v638_v42 }
 0x150   :  { %v1230_v53 = vpack.c.bf16 %v505_v49, %v502_v47  ;;  %v1310_v54 = vpack.c.bf16 %v633_v50, %v630_v48 }
 0x151   :  { %1339 = vst [vmem:[#allocation7 + $0x68] sm:$0xff] %v1235_v51   ;;  %1355 = vst [vmem:[#allocation7 + $0xe8] sm:$0xff] %v1315_v52  }
 0x152   :  { %1338 = vst [vmem:[#allocation7 + $0x60] sm:$0xff] %v1230_v53   ;;  %1354 = vst [vmem:[#allocation7 + $0xe0] sm:$0xff] %v1310_v54   ;;  %v1444_v55 = vpop.f32.mrb[28].mxu0  ;;  %v1476_v56 = vpop.f32.mrb[28].mxu1 }
 0x153   :  { %v517_v57 = vpop.f32.mrb[29].mxu0  ;;  %v645_v58 = vpop.f32.mrb[29].mxu1  ;;  %v526_v61 = vadd.f32 %v1444_v55, %v1669_v41  ;;  %v654_v62 = vadd.f32 %v1476_v56, %v1669_v41 }
 0x154   :  { %v1445_v59 = vpop.f32.mrb[30].mxu0  ;;  %v1477_v60 = vpop.f32.mrb[30].mxu1  ;;  %v518_v3 = vadd.f32 %v1669_v41, %v517_v57  ;;  %v646_v4 = vadd.f32 %v1669_v41, %v645_v58 }
 0x155   :  { %v529_v63 = vadd.f32 %v1445_v59, %v1669_v41  ;;  %v657_v0 = vadd.f32 %v1477_v60, %v1669_v41  ;;  %v520_v1 = vpop.f32.mrb[31].mxu0  ;;  %v648_v2 = vpop.f32.mrb[31].mxu1 }
 0x156   :  { %v521_v5 = vadd.f32 %v1669_v41, %v520_v1  ;;  %v649_v6 = vadd.f32 %v1669_v41, %v648_v2 }
 0x157   :  { %v1245_v7 = vpack.c.bf16 %v529_v63, %v526_v61  ;;  %v1325_v8 = vpack.c.bf16 %v657_v0, %v654_v62 }
 0x158   :  { %v1240_v9 = vpack.c.bf16 %v521_v5, %v518_v3  ;;  %v1320_v10 = vpack.c.bf16 %v649_v6, %v646_v4 }
 0x159   :  { %1341 = vst [vmem:[#allocation7 + $0x78] sm:$0xff] %v1245_v7   ;;  %1357 = vst [vmem:[#allocation7 + $0xf8] sm:$0xff] %v1325_v8  }
 0x15a   :  { %1340 = vst [vmem:[#allocation7 + $0x70] sm:$0xff] %v1240_v9   ;;  %1356 = vst [vmem:[#allocation7 + $0xf0] sm:$0xff] %v1320_v10  }
 0x15b   :  { %1594 = shalt.err (!%p1591_p6)
}
 0x15c   :  { %s1595_s15 = scalar_lea.hbm %s1753_s3, 4096 }
 0x15d   :  { %p1596_p7 = scmp.ne.s32.totalorder %s1753_s3, %s1595_s15  ;;  %p1599_p8 = scmp.lt.u32.totalorder %s1595_s15, %s1753_s3 }
 0x15f   :  { %p1601_p9 = pnand %p1599_p8, %p1596_p7 }
 0x161   :  { %1604 = shalt.err (!%p1601_p9)
}
 0x162   :  { %991 = dma.vmem_to_hbm [thread:$0]  %s986_s11, 4096, %s1753_s3, [#allocation4], %s1612_s22, %s1612_s22, %s1613_s23  }
 0x163   :  { %1609 = dma.done.wait [#allocation4], 4096  }
 0x164   :  { %1610 = vsyncadd [#allocation4], 4294963200 }
 0x165   :  { %995 = vsyncpa [#allocation3], 1 }
 0x166   :  { %996 = vsyncpa [#allocation6], 1 }
 0x167   :  { %997 = vsyncpa [#allocation4], 1 }

</bundles_post_ra>
